<compile_context>
chip_gen: v7x
topology: tpu7x:2x2x1
jax: 0.10.0
libtpu: 0.0.40
codegen_flags: <defaults>
</compile_context>

<pallas_src>
import numpy as np
import jax
import jax.numpy as jnp
from jax.experimental import pallas as pl
from jax.experimental.pallas import tpu as pltpu


NEG_SLOPE = 0.2            # GATv2Conv default negative_slope
LANE = 128                 # TPU lane width; feature dims are padded to this
ROW_TILE = 128             # target-node rows per attention grid step
VMEM_LIMIT = 48 * 1024 * 1024


def _round_up(x, m):
    return ((x + m - 1) // m) * m


# ----------------------------------------------------------------------------
# Kernel 1: hoisted projection  g = X @ [Wl | Wr] + [bl | br]
# Computed once per layer so the attention grid below is fully "parallel".
# ----------------------------------------------------------------------------
def proj_kernel(x_ref, w_ref, b_ref, g_ref):
    g_ref[...] = (
        jnp.dot(x_ref[...], w_ref[...], preferred_element_type=jnp.float32)
        + b_ref[...]
    )


# ----------------------------------------------------------------------------
# Kernel 2: GATv2 attention + aggregation (+ output bias + fused ReLU) for one
# 128-row tile of target nodes.  All intermediates are 2-D and lane-dense.
# ----------------------------------------------------------------------------
def gatv2_attn_kernel(gl_ref, gr_ref, cnt_ref, att_ref, bias_ref, o_ref):
    gl = gl_ref[...]          # [Np, F]  source transform (attention "values")
    att = att_ref[...]        # [1, F]
    bias = bias_ref[...]      # [1, F]
    tm = o_ref.shape[0]

    def row_body(i, carry):
        # Target node i of this tile.
        gr_i = gr_ref[pl.ds(i, 1), :]                       # [1, F]
        # GATv2 logits against every source node j:
        #   s[j] = att . leaky_relu(gl[j] + gr[i])
        z = gl + gr_i                                       # [Np, F]
        z = jnp.where(z >= 0.0, z, NEG_SLOPE * z)           # LeakyReLU(0.2)
        s = jnp.sum(z * att, axis=1, keepdims=True)         # [Np, 1]
        # Numerically-stabilized exp.  The max is taken over *all* sources
        # (a superset of the valid neighbors); the shift cancels exactly in
        # the normalized ratio below, so this only affects fp conditioning.
        e = jnp.exp(s - jnp.max(s))                         # [Np, 1]
        # cnt_row[j] = multiplicity of edge j -> i (0 = not a neighbor).
        # Masking + multiplicity weighting are folded into the two dots.
        cnt_row = cnt_ref[pl.ds(i, 1), :]                   # [1, Np]
        denom = jnp.dot(cnt_row, e,
                        preferred_element_type=jnp.float32)           # [1, 1]
        num = jnp.dot(cnt_row, e * gl,
                      preferred_element_type=jnp.float32)             # [1, F]
        out_row = num / denom + bias
        # ReLU from GAT.forward fused here; dropout is identity in eval mode.
        o_ref[pl.ds(i, 1), :] = jnp.maximum(out_row, 0.0)
        return carry

    jax.lax.fori_loop(0, tm, row_body, 0)


# ----------------------------------------------------------------------------
# One GATv2Conv layer (+ fused ReLU) on padded inputs.
# ----------------------------------------------------------------------------
def gatv2_layer(x_p, cnt_p, w_cat, b_cat, att_p, bias_p):
    """x_p:   [Np, Fin_p]        padded node features
    cnt_p:    [Np, Np]           cnt[i, j] = multiplicity of edge j -> i (+ self-loops)
    w_cat:    [Fin_p, 2*Fout_p]  = [Wl | Wr]  (zero padded)
    b_cat:    [1, 2*Fout_p]      = [bl | br]
    att_p:    [1, Fout_p]
    bias_p:   [1, Fout_p]
    returns   [Np, Fout_p]
    """
    n_pad, f_in_p = x_p.shape
    two_f = w_cat.shape[1]
    f_out_p = two_f // 2
    assert n_pad % ROW_TILE == 0

    compiler_params = pltpu.CompilerParams(
        dimension_semantics=("parallel",),
        vmem_limit_bytes=VMEM_LIMIT,
    )

    # ---- hoisted projection: g = x @ [Wl | Wr] + [bl | br] ----
    g = pl.pallas_call(
        proj_kernel,
        out_shape=jax.ShapeDtypeStruct((n_pad, two_f), jnp.float32),
        grid_spec=pltpu.PrefetchScalarGridSpec(
            num_scalar_prefetch=0,
            grid=(n_pad // ROW_TILE,),
            in_specs=[
                pl.BlockSpec((ROW_TILE, f_in_p), lambda i: (i, 0)),
                pl.BlockSpec((f_in_p, two_f), lambda i: (0, 0)),
                pl.BlockSpec((1, two_f), lambda i: (0, 0)),
            ],
            out_specs=pl.BlockSpec((ROW_TILE, two_f), lambda i: (i, 0)),
        ),
        compiler_params=compiler_params,
    )(x_p, w_cat, b_cat)

    # ---- attention + aggregation over row tiles of target nodes ----
    # `g` is passed twice with different BlockSpecs: full left half (gl, all
    # source nodes, grid-invariant and resident) and the right-half row tile
    # (gr for the targets of this grid step).  No wrapper-side slicing/copies.
    out = pl.pallas_call(
        gatv2_attn_kernel,
        out_shape=jax.ShapeDtypeStruct((n_pad, f_out_p), jnp.float32),
        grid_spec=pltpu.PrefetchScalarGridSpec(
            num_scalar_prefetch=0,
            grid=(n_pad // ROW_TILE,),
            in_specs=[
                pl.BlockSpec((n_pad, f_out_p), lambda i: (0, 0)),     # gl (all)
                pl.BlockSpec((ROW_TILE, f_out_p), lambda i: (i, 1)),  # gr tile
                pl.BlockSpec((ROW_TILE, n_pad), lambda i: (i, 0)),    # mask tile
                pl.BlockSpec((1, f_out_p), lambda i: (0, 0)),         # att
                pl.BlockSpec((1, f_out_p), lambda i: (0, 0)),         # bias
            ],
            out_specs=pl.BlockSpec((ROW_TILE, f_out_p), lambda i: (i, 0)),
        ),
        compiler_params=compiler_params,
    )(g, g, cnt_p, att_p, bias_p)
    return out


# ----------------------------------------------------------------------------
# Plain-JAX glue: mask construction, padding, full model.
# ----------------------------------------------------------------------------
def build_neighbor_counts(edge_index, n_pad):
    """cnt[i, j] = multiplicity of edge j -> i, with existing self-loops removed
    and one self-loop re-added per node (PyG add_self_loops semantics).  Padded
    rows also get a self-loop so their (discarded) softmax is well defined."""
    src = edge_index[0]
    dst = edge_index[1]
    not_self = (src != dst).astype(jnp.float32)
    cnt = jnp.zeros((n_pad, n_pad), jnp.float32)
    cnt = cnt.at[dst, src].add(not_self)
    cnt = cnt + jnp.eye(n_pad, dtype=jnp.float32)
    return cnt


def pad_layer_params(wl, wr, bl, br, att, bias):
    f_in, f_out = wl.shape
    f_in_p = _round_up(f_in, LANE)
    f_out_p = _round_up(f_out, LANE)
    w_cat = jnp.zeros((f_in_p, 2 * f_out_p), jnp.float32)
    w_cat = w_cat.at[:f_in, :f_out].set(wl)
    w_cat = w_cat.at[:f_in, f_out_p:f_out_p + f_out].set(wr)
    b_cat = jnp.zeros((1, 2 * f_out_p), jnp.float32)
    b_cat = b_cat.at[0, :f_out].set(bl)
    b_cat = b_cat.at[0, f_out_p:f_out_p + f_out].set(br)
    att_p = jnp.zeros((1, f_out_p), jnp.float32).at[0, :f_out].set(att)
    bias_p = jnp.zeros((1, f_out_p), jnp.float32).at[0, :f_out].set(bias)
    return w_cat, b_cat, att_p, bias_p


def gat_forward(params, node_features, edge_index, edge_attr=None):
    """GAT.forward: GATv2Conv -> ReLU -> dropout (eval: identity), per layer."""
    # TODO(synk): edge_attr is ignored -- GATv2Conv(in, out) without edge_dim has
    # no lin_edge, so the reference module itself cannot consume edge features.
    del edge_attr
    n, f_in = node_features.shape
    n_pad = _round_up(n, ROW_TILE)
    cnt = build_neighbor_counts(edge_index, n_pad)

    x = jnp.zeros((n_pad, _round_up(f_in, LANE)), jnp.float32)
    x = x.at[:n, :f_in].set(node_features)

    f_out = f_in
    for (wl, wr, bl, br, att, bias) in params:
        f_out = wl.shape[1]
        w_cat, b_cat, att_p, bias_p = pad_layer_params(wl, wr, bl, br, att, bias)
        x = gatv2_layer(x, cnt, w_cat, b_cat, att_p, bias_p)
        # TODO(synk): F.dropout(training=True) not implemented (eval mode => identity).
    return x[:n, :f_out]


# Pure-JAX reference for verification (same GATv2 math, unpadded, dense).
def gat_forward_ref(params, node_features, edge_index, edge_attr=None):
    del edge_attr
    n = node_features.shape[0]
    src, dst = edge_index[0], edge_index[1]
    not_self = (src != dst).astype(jnp.float32)
    cnt = jnp.zeros((n, n), jnp.float32).at[dst, src].add(not_self)
    cnt = cnt + jnp.eye(n, dtype=jnp.float32)          # cnt[i, j] = # edges j -> i
    x = node_features
    for (wl, wr, bl, br, att, bias) in params:
        gl = x @ wl + bl
        gr = x @ wr + br
        z = gr[:, None, :] + gl[None, :, :]            # [i, j, f]
        z = jnp.where(z >= 0.0, z, NEG_SLOPE * z)
        s = jnp.sum(z * att[None, None, :], axis=-1)   # [i, j]
        s = jnp.where(cnt > 0.0, s, -1e30)
        m = jnp.max(s, axis=-1, keepdims=True)
        p = jnp.exp(s - m) * cnt
        alpha = p / jnp.sum(p, axis=-1, keepdims=True)
        x = alpha @ gl + bias
        x = jnp.maximum(x, 0.0)
    return x


def init_gat_params(key, input_dim, layers):
    params = []
    dims = [input_dim] + list(layers)
    for i in range(1, len(dims)):
        f_in, f_out = dims[i - 1], dims[i]
        key, kwl, kwr, kbl, kbr, ka, kb = jax.random.split(key, 7)
        s = 1.0 / np.sqrt(f_in)
        sa = 1.0 / np.sqrt(f_out)
        wl = jax.random.uniform(kwl, (f_in, f_out), jnp.float32, -s, s)
        wr = jax.random.uniform(kwr, (f_in, f_out), jnp.float32, -s, s)
        bl = jax.random.uniform(kbl, (f_out,), jnp.float32, -s, s)
        br = jax.random.uniform(kbr, (f_out,), jnp.float32, -s, s)
        att = jax.random.uniform(ka, (f_out,), jnp.float32, -sa, sa)
        bias = jax.random.uniform(kb, (f_out,), jnp.float32, -s, s)
        params.append((wl, wr, bl, br, att, bias))
    return params


if __name__ == "__main__":
    # Small deterministic problem.
    N = 16            # nodes
    E = 48            # edges
    input_dim = 8     # node feature dim F
    layers = [32, 16]

    key = jax.random.PRNGKey(0)
    k_feat, k_src, k_dst, k_param = jax.random.split(key, 4)

    node_features = jax.random.normal(k_feat, (N, input_dim), jnp.float32)
    src = jax.random.randint(k_src, (E,), 0, N, jnp.int32)
    dst = jax.random.randint(k_dst, (E,), 0, N, jnp.int32)
    edge_index = jnp.stack([src, dst], axis=0)          # [2, E]

    params = init_gat_params(k_param, input_dim, layers)

    out = gat_forward(params, node_features, edge_index)
    out = jax.block_until_ready(out)

    ref = gat_forward_ref(params, node_features, edge_index)
    ref = jax.block_until_ready(ref)

    assert out.shape == (N, layers[-1]), out.shape
    np.testing.assert_allclose(np.asarray(out), np.asarray(ref),
                               rtol=1e-4, atol=1e-4)
    print("KERNEL_OK")
</pallas_src>

<mosaic_0001>
module attributes {stable_mosaic.version = 11 : i64} {
  func.func @proj_kernel(%arg0: i32, %arg1: memref<128x128xf32, #tpu.memory_space<vmem>>, %arg2: memref<128x256xf32, #tpu.memory_space<vmem>>, %arg3: memref<1x256xf32, #tpu.memory_space<vmem>>, %arg4: memref<128x256xf32, #tpu.memory_space<vmem>>) attributes {dimension_semantics = [#tpu.dimension_semantics<parallel>], iteration_bounds = array<i64: 1>, scalar_prefetch = 0 : i64, scratch_operands = 0 : i64, tpu.core_type = #tpu.core_type<tc>, window_params = [{transform_indices = @transform_0, window_bounds = array<i64: 128, 128>}, {pipeline_mode = #tpu.pipeline_mode<synchronous>, transform_indices = @transform_1, window_bounds = array<i64: 128, 256>}, {pipeline_mode = #tpu.pipeline_mode<synchronous>, transform_indices = @transform_2, window_bounds = array<i64: 1, 256>}, {transform_indices = @transform_3, window_bounds = array<i64: 128, 256>}]} {
    %c0 = arith.constant 0 : index
    %c0_0 = arith.constant 0 : index
    %0 = vector.load %arg1[%c0, %c0_0] : memref<128x128xf32, #tpu.memory_space<vmem>>, vector<128x128xf32>
    %c0_1 = arith.constant 0 : index
    %c0_2 = arith.constant 0 : index
    %1 = vector.load %arg2[%c0_1, %c0_2] : memref<128x256xf32, #tpu.memory_space<vmem>>, vector<128x256xf32>
    %cst = arith.constant dense<0.000000e+00> : vector<128x256xf32>
    %2 = tpu.matmul %0, %1, %cst {dimension_numbers = #tpu.dot_dimension_numbers<[1], [0], [0], [1], [0, 0, 1, 1], [], []>} : vector<128x128xf32>, vector<128x256xf32>, vector<128x256xf32> -> vector<128x256xf32>
    %c0_3 = arith.constant 0 : index
    %c0_4 = arith.constant 0 : index
    %3 = vector.load %arg3[%c0_3, %c0_4] : memref<1x256xf32, #tpu.memory_space<vmem>>, vector<1x256xf32>
    %4 = vector.broadcast %3 : vector<1x256xf32> to vector<128x256xf32>
    %5 = arith.addf %2, %4 : vector<128x256xf32>
    %c0_5 = arith.constant 0 : index
    %c0_6 = arith.constant 0 : index
    %6 = vector.load %arg4[%c0_5, %c0_6] : memref<128x256xf32, #tpu.memory_space<vmem>>, vector<128x256xf32>
    tpu.vector_store %arg4[%c0_5, %c0_6], %5 {strides = array<i32>} : memref<128x256xf32, #tpu.memory_space<vmem>>, vector<128x256xf32>,
    return
  }
  func.func @transform_0(%arg0: i32) -> (i32, i32) {
    %c0_i32 = arith.constant 0 : i32
    %c0_i32_0 = arith.constant 0 : i32
    return %arg0, %c0_i32 : i32, i32
  }
  func.func @transform_1(%arg0: i32) -> (i32, i32) {
    %c0_i32 = arith.constant 0 : i32
    %c0_i32_0 = arith.constant 0 : i32
    %c0_i32_1 = arith.constant 0 : i32
    return %c0_i32, %c0_i32_0 : i32, i32
  }
  func.func @transform_2(%arg0: i32) -> (i32, i32) {
    %c0_i32 = arith.constant 0 : i32
    %c0_i32_0 = arith.constant 0 : i32
    %c0_i32_1 = arith.constant 0 : i32
    return %c0_i32, %c0_i32_0 : i32, i32
  }
  func.func @transform_3(%arg0: i32) -> (i32, i32) {
    %c0_i32 = arith.constant 0 : i32
    %c0_i32_0 = arith.constant 0 : i32
    return %arg0, %c0_i32 : i32, i32
  }
}

</mosaic_0001>

<bundles_post_ra>
// kernel: tpu_custom_call.1
= control target key start
LH: loop header
LB: loop body
LE: loop exit
PB: predicated region body
PF: predicated region fallthrough
CT: control target
= control target key end

     0   :  { %8 = vsyncpa [#allocation3], 0  ;;  %s567_s0 = inlined_call_operand.hbm [shape: f32[128,128], index: 0, kind: input, shape index: {}]   ;;  %s568_s1 = inlined_call_operand.hbm [shape: f32[128,256], index: 1, kind: input, shape index: {}]   ;;  %s569_s2 = inlined_call_operand.vmem [shape: f32[1,256], index: 2, kind: input, shape index: {}]   ;;  %s570_s3 = inlined_call_operand.hbm [shape: f32[128,256], index: 3, kind: output, shape index: {}]  }
   0x1   :  { %9 = vsyncpa [#allocation6], 0 }
   0x2   :  { %10 = vsyncpa [#allocation4], 0  ;;  %s442_s12 = smov [#allocation2]   ;;  %s370_s16 = scalar_lea.hbm %s567_s0, 2048 }
   0x3   :  { %s16_s13 = sshll.u32 %s442_s12, 4  ;;  %p371_p0 = scmp.ne.s32.totalorder %s567_s0, %s370_s16  ;;  %s17_s13 = int_to_ptr.vmem [resolvable:$true] %s16_s13 }
   0x4   :  { %p374_p1 = scmp.lt.u32.totalorder %s370_s16, %s567_s0 }
   0x6   :  { %p376_p2 = pnand %p374_p1, %p371_p0 }
   0x8   :  { %379 = shalt.err (!%p376_p2)
}
   0x9   :  { %s380_s21 = scalar_lea.vmem %s17_s13, 2048  ;;  %p385_p4 = scmp.lt.s32.totalorder %s17_s13, %s17_s13 }
   0xa   :  { %p381_p3 = scmp.ne.s32.totalorder %s17_s13, %s380_s21  ;;  %p386_p5 = scmp.lt.s32.totalorder %s380_s21, %s380_s21 }
   0xc   :  { %p387_p6 = por %p386_p5, %p385_p4 }
   0xe   :  { %p388_p7 = pnand %p387_p6, %p381_p3 }
  0x10   :  { %391 = shalt.err (!%p388_p7)
}
  0x11   :  { %s443_s22 = smov 128   ;;  %s444_s23 = smov 8  }
  0x12   :  { %22 = dma.hbm_to_vmem [thread:$0]  %s567_s0, 2048, %s17_s13, [#allocation3], %s443_s22, %s443_s22, %s444_s23  }
  0x13   :  { %s445_s26 = smov [#allocation5]   ;;  %s392_s30 = scalar_lea.hbm %s568_s1, 4096 }
  0x14   :  { %s28_s27 = sshll.u32 %s445_s26, 4  ;;  %p393_p8 = scmp.ne.s32.totalorder %s568_s1, %s392_s30  ;;  %s29_s27 = int_to_ptr.vmem [resolvable:$true] %s28_s27 }
  0x15   :  { %p396_p9 = scmp.lt.u32.totalorder %s392_s30, %s568_s1 }
  0x17   :  { %p398_p10 = pnand %p396_p9, %p393_p8 }
  0x19   :  { %401 = shalt.err (!%p398_p10)
}
  0x1a   :  { %s402_s8 = scalar_lea.vmem %s29_s27, 4096  ;;  %p407_p12 = scmp.lt.s32.totalorder %s29_s27, %s29_s27 }
  0x1b   :  { %p403_p11 = scmp.ne.s32.totalorder %s29_s27, %s402_s8  ;;  %p408_p13 = scmp.lt.s32.totalorder %s402_s8, %s402_s8 }
  0x1d   :  { %p409_p0 = por %p408_p13, %p407_p12 }
  0x1f   :  { %p410_p1 = pnand %p409_p0, %p403_p11 }
  0x21   :  { %413 = shalt.err (!%p410_p1)
}
  0x22   :  { %s446_s0 = smov 256   ;;  %s447_s9 = smov 16  }
  0x23   :  { %34 = dma.hbm_to_vmem [thread:$0]  %s568_s1, 4096, %s29_s27, [#allocation6], %s446_s0, %s446_s0, %s447_s9  }
  0x24   :  { %436 = dma.done.wait [#allocation3], 2048  }
  0x25   :  { %437 = vsyncadd [#allocation3], 4294965248 }
  0x26   :  { %438 = dma.done.wait [#allocation6], 4096  }
  0x27   :  { %439 = vsyncadd [#allocation6], 4294963200  ;;  %v448_v0 = vmov 0.0   ;;  %v60_v1 = vld [vmem:[#allocation5 + $0x8] sm:$0xff]  ;;  %v62_v2 = vld [vmem:[#allocation5 + $0x18] sm:$0xff] }
  0x28   :  { %167 = vmatprep.mubr.f32.mxu0 %v448_v0  ;;  %215 = vmatprep.mubr.f32.mxu1 %v448_v0  ;;  %v59_v3 = vld [vmem:[#allocation5] sm:$0xff]  ;;  %v314_v4 = vpack.c.bf16 %v62_v2, %v60_v1  ;;  %v61_v5 = vld [vmem:[#allocation5 + $0x10] sm:$0xff]  ;;  %v64_v6 = vld [vmem:[#allocation5 + $0x28] sm:$0xff]  ;;  %v93_v2 = vlaneseq }
  0x29   :  { %v66_v7 = vld [vmem:[#allocation5 + $0x38] sm:$0xff]  ;;  %v316_v8 = vpack.c.bf16 %v61_v5, %v59_v3  ;;  %v63_v10 = vld [vmem:[#allocation5 + $0x20] sm:$0xff]  ;;  %v65_v11 = vld [vmem:[#allocation5 + $0x30] sm:$0xff] }
  0x2a   :  { %v318_v9 = vpack.c.bf16 %v66_v7, %v64_v6  ;;  %v68_v12 = vld [vmem:[#allocation5 + $0x48] sm:$0xff]  ;;  %315 = vmatprep.subr.bf16.mxu0 %v314_v4  ;;  %346 = vmatprep.subr.bf16.mxu1 %v314_v4  ;;  %v70_v13 = vld [vmem:[#allocation5 + $0x58] sm:$0xff]  ;;  %v320_v14 = vpack.c.bf16 %v65_v11, %v63_v10  ;;  %v67_v16 = vld [vmem:[#allocation5 + $0x40] sm:$0xff]  ;;  %v94_v3 = vshrl.u32 %v93_v2, 7 }
  0x2b   :  { %317 = vmatpush1.bf16.msra.mxu0 %v316_v8  ;;  %354 = vmatpush1.bf16.msra.mxu1 %v316_v8  ;;  %v322_v15 = vpack.c.bf16 %v70_v13, %v68_v12  ;;  %v69_v17 = vld [vmem:[#allocation5 + $0x50] sm:$0xff]  ;;  %v72_v18 = vld [vmem:[#allocation5 + $0x68] sm:$0xff]  ;;  %v74_v19 = vld [vmem:[#allocation5 + $0x78] sm:$0xff] }
  0x2c   :  { %319 = vmatprep.subr.bf16.mxu0 %v318_v9  ;;  %347 = vmatprep.subr.bf16.mxu1 %v318_v9  ;;  %v324_v20 = vpack.c.bf16 %v69_v17, %v67_v16  ;;  %v326_v21 = vpack.c.bf16 %v74_v19, %v72_v18  ;;  %v71_v22 = vld [vmem:[#allocation5 + $0x60] sm:$0xff]  ;;  %v73_v23 = vld [vmem:[#allocation5 + $0x70] sm:$0xff]  ;;  %v76_v24 = vld [vmem:[#allocation5 + $0x88] sm:$0xff]  ;;  %v95_v4 = vsub.s32 0, %v94_v3  ;;  %v99_v6 = vsub.s32 1, %v94_v3 }
  0x2d   :  { %v78_v25 = vld [vmem:[#allocation5 + $0x98] sm:$0xff]  ;;  %v328_v26 = vpack.c.bf16 %v73_v23, %v71_v22  ;;  %v75_v28 = vld [vmem:[#allocation5 + $0x80] sm:$0xff]  ;;  %v77_v29 = vld [vmem:[#allocation5 + $0x90] sm:$0xff] }
  0x2e   :  { %v330_v27 = vpack.c.bf16 %v78_v25, %v76_v24  ;;  %v80_v30 = vld [vmem:[#allocation5 + $0xa8] sm:$0xff]  ;;  %v82_v31 = vld [vmem:[#allocation5 + $0xb8] sm:$0xff]  ;;  %v332_v32 = vpack.c.bf16 %v77_v29, %v75_v28  ;;  %v79_v34 = vld [vmem:[#allocation5 + $0xa0] sm:$0xff] }
  0x2f   :  { %321 = vmatpush1.bf16.msra.mxu0 %v320_v14  ;;  %355 = vmatpush1.bf16.msra.mxu1 %v320_v14  ;;  %v334_v33 = vpack.c.bf16 %v82_v31, %v80_v30  ;;  %v81_v35 = vld [vmem:[#allocation5 + $0xb0] sm:$0xff]  ;;  %v84_v36 = vld [vmem:[#allocation5 + $0xc8] sm:$0xff]  ;;  %v86_v37 = vld [vmem:[#allocation5 + $0xd8] sm:$0xff] }
  0x30   :  { %323 = vmatprep.subr.bf16.mxu0 %v322_v15  ;;  %348 = vmatprep.subr.bf16.mxu1 %v322_v15  ;;  %v336_v38 = vpack.c.bf16 %v81_v35, %v79_v34  ;;  %v338_v39 = vpack.c.bf16 %v86_v37, %v84_v36  ;;  %v83_v40 = vld [vmem:[#allocation5 + $0xc0] sm:$0xff]  ;;  %v85_v41 = vld [vmem:[#allocation5 + $0xd0] sm:$0xff]  ;;  %v88_v42 = vld [vmem:[#allocation5 + $0xe8] sm:$0xff] }
  0x31   :  { %v90_v43 = vld [vmem:[#allocation5 + $0xf8] sm:$0xff]  ;;  %v340_v44 = vpack.c.bf16 %v85_v41, %v83_v40  ;;  %v87_v46 = vld [vmem:[#allocation5 + $0xe0] sm:$0xff]  ;;  %v89_v47 = vld [vmem:[#allocation5 + $0xf0] sm:$0xff] }
  0x32   :  { %v342_v45 = vpack.c.bf16 %v90_v43, %v88_v42  ;;  %v344_v48 = vpack.c.bf16 %v89_v47, %v87_v46  ;;  %v43_v49 = vld [vmem:[#allocation2] sm:$0xff]  ;;  %v44_v51 = vld [vmem:[#allocation2 + $0x8] sm:$0xff]  ;;  %v45_v53 = vld [vmem:[#allocation2 + $0x10] sm:$0xff] }
  0x33   :  { %325 = vmatpush1.bf16.msra.mxu0 %v324_v20  ;;  %356 = vmatpush1.bf16.msra.mxu1 %v324_v20  ;;  %v51_v50 = vld [vmem:[#allocation2 + $0x40] sm:$0xff]  ;;  %v52_v52 = vld [vmem:[#allocation2 + $0x48] sm:$0xff]  ;;  %v53_v54 = vld [vmem:[#allocation2 + $0x50] sm:$0xff] }
  0x34   :  { %327 = vmatprep.subr.bf16.mxu0 %v326_v21  ;;  %349 = vmatprep.subr.bf16.mxu1 %v326_v21  ;;  %v46_v55 = vld [vmem:[#allocation2 + $0x18] sm:$0xff]  ;;  %v47_v57 = vld [vmem:[#allocation2 + $0x20] sm:$0xff]  ;;  %v48_v59 = vld [vmem:[#allocation2 + $0x28] sm:$0xff] }
  0x35   :  { %v54_v56 = vld [vmem:[#allocation2 + $0x58] sm:$0xff]  ;;  %v55_v58 = vld [vmem:[#allocation2 + $0x60] sm:$0xff]  ;;  %v56_v60 = vld [vmem:[#allocation2 + $0x68] sm:$0xff] }
  0x36   :  { %v49_v61 = vld [vmem:[#allocation2 + $0x30] sm:$0xff]  ;;  %v50_v63 = vld [vmem:[#allocation2 + $0x38] sm:$0xff]  ;;  %v91_v5 = vld [vmem:[%s569_s2] sm:$0x3]  ;;  %s449_s2 = smov [#allocation7]  }
  0x37   :  { %329 = vmatpush1.bf16.msra.mxu0 %v328_v26  ;;  %357 = vmatpush1.bf16.msra.mxu1 %v328_v26  ;;  %v57_v62 = vld [vmem:[#allocation2 + $0x70] sm:$0xff]  ;;  %v58_v1 = vld [vmem:[#allocation2 + $0x78] sm:$0xff]  ;;  %v516_v7 = vrot.slane %v91_v5, %v95_v4  ;;  %v518_v8 = vrot.slane %v91_v5, %v99_v6  ;;  %s301_s13 = sshll.u32 %s449_s2, 4  ;;  %s302_s13 = int_to_ptr.vmem [resolvable:$true] %s301_s13 }
  0x38   :  { %331 = vmatprep.subr.bf16.mxu0 %v330_v27  ;;  %350 = vmatprep.subr.bf16.mxu1 %v330_v27  ;;  %s414_s14 = scalar_lea.vmem %s302_s13, 4096  ;;  %p419_p3 = scmp.lt.s32.totalorder %s302_s13, %s302_s13 }
  0x39   :  { %p415_p2 = scmp.ne.s32.totalorder %s302_s13, %s414_s14  ;;  %p420_p4 = scmp.lt.s32.totalorder %s414_s14, %s414_s14 }
  0x3b   :  { %333 = vmatpush1.bf16.msra.mxu0 %v332_v32  ;;  %358 = vmatpush1.bf16.msra.mxu1 %v332_v32  ;;  %p421_p5 = por %p420_p4, %p419_p3 }
  0x3c   :  { %335 = vmatprep.subr.bf16.mxu0 %v334_v33  ;;  %351 = vmatprep.subr.bf16.mxu1 %v334_v33 }
  0x3d   :  { %p422_p6 = pnand %p421_p5, %p415_p2 }
  0x3f   :  { %337 = vmatpush1.bf16.msra.mxu0 %v336_v38  ;;  %359 = vmatpush1.bf16.msra.mxu1 %v336_v38 }
  0x40   :  { %339 = vmatprep.subr.bf16.mxu0 %v338_v39  ;;  %352 = vmatprep.subr.bf16.mxu1 %v338_v39 }
  0x43   :  { %341 = vmatpush1.bf16.msra.mxu0 %v340_v44  ;;  %360 = vmatpush1.bf16.msra.mxu1 %v340_v44 }
  0x44   :  { %343 = vmatprep.subr.bf16.mxu0 %v342_v45  ;;  %353 = vmatprep.subr.bf16.mxu1 %v342_v45 }
  0x47   :  { %345 = vmatpush1.bf16.msra.mxu0 %v344_v48  ;;  %361 = vmatpush1.bf16.msra.mxu1 %v344_v48 }
  0x4a   :  { %168 = vmatmul.mubr.f32.vlgmr.msra.gmra.mrb[0].mxu0 %v43_v49  ;;  %216 = vmatmul.mubr.f32.vlgmr.msra.gmra.mrb[0].mxu1 %v51_v50 }
  0x4b   :  { %173 = vmatprep.mubr.f32.mxu0 %v448_v0  ;;  %221 = vmatprep.mubr.f32.mxu1 %v448_v0 }
  0x4e   :  { %174 = vmatmul.mubr.f32.gmra.mrb[2].mxu0 %v44_v51  ;;  %222 = vmatmul.mubr.f32.gmra.mrb[2].mxu1 %v52_v52 }
  0x4f   :  { %179 = vmatprep.mubr.f32.mxu0 %v448_v0  ;;  %227 = vmatprep.mubr.f32.mxu1 %v448_v0 }
  0x52   :  { %180 = vmatmul.mubr.f32.gmra.mrb[4].mxu0 %v45_v53  ;;  %228 = vmatmul.mubr.f32.gmra.mrb[4].mxu1 %v53_v54 }
  0x53   :  { %185 = vmatprep.mubr.f32.mxu0 %v448_v0  ;;  %233 = vmatprep.mubr.f32.mxu1 %v448_v0 }
  0x56   :  { %186 = vmatmul.mubr.f32.gmra.mrb[6].mxu0 %v46_v55  ;;  %234 = vmatmul.mubr.f32.gmra.mrb[6].mxu1 %v54_v56 }
  0x57   :  { %191 = vmatprep.mubr.f32.mxu0 %v448_v0  ;;  %239 = vmatprep.mubr.f32.mxu1 %v448_v0 }
  0x5a   :  { %192 = vmatmul.mubr.f32.gmra.mrb[8].mxu0 %v47_v57  ;;  %240 = vmatmul.mubr.f32.gmra.mrb[8].mxu1 %v55_v58 }
  0x5b   :  { %197 = vmatprep.mubr.f32.mxu0 %v448_v0  ;;  %245 = vmatprep.mubr.f32.mxu1 %v448_v0 }
  0x5e   :  { %198 = vmatmul.mubr.f32.gmra.mrb[10].mxu0 %v48_v59  ;;  %246 = vmatmul.mubr.f32.gmra.mrb[10].mxu1 %v56_v60 }
  0x5f   :  { %203 = vmatprep.mubr.f32.mxu0 %v448_v0  ;;  %251 = vmatprep.mubr.f32.mxu1 %v448_v0 }
  0x62   :  { %204 = vmatmul.mubr.f32.gmra.mrb[12].mxu0 %v49_v61  ;;  %252 = vmatmul.mubr.f32.gmra.mrb[12].mxu1 %v57_v62 }
  0x63   :  { %209 = vmatprep.mubr.f32.mxu0 %v448_v0  ;;  %257 = vmatprep.mubr.f32.mxu1 %v448_v0 }
  0x66   :  { %210 = vmatmul.mubr.f32.gmra.mrb[14].mxu0 %v50_v63  ;;  %258 = vmatmul.mubr.f32.gmra.mrb[14].mxu1 %v58_v1 }
 0x11d   :  { %v169_v9 = vpop.f32.mrb[0].mxu0  ;;  %v217_v10 = vpop.f32.mrb[0].mxu1 }
 0x11e   :  { %v170_v0 = vadd.f32 %v169_v9, %v516_v7  ;;  %v218_v11 = vadd.f32 %v217_v10, %v516_v7  ;;  %v171_v12 = vpop.f32.mrb[1].mxu0  ;;  %v219_v13 = vpop.f32.mrb[1].mxu1 }
 0x11f   :  { %v172_v14 = vadd.f32 %v171_v12, %v518_v8  ;;  %v220_v15 = vadd.f32 %v219_v13, %v518_v8 }
 0x120   :  { %264 = vst [vmem:[#allocation7] sm:$0xff] %v170_v0  ;;  %280 = vst [vmem:[#allocation7 + $0x80] sm:$0xff] %v218_v11 }
 0x121   :  { %265 = vst [vmem:[#allocation7 + $0x8] sm:$0xff] %v172_v14  ;;  %281 = vst [vmem:[#allocation7 + $0x88] sm:$0xff] %v220_v15  ;;  %v175_v16 = vpop.f32.mrb[2].mxu0  ;;  %v223_v17 = vpop.f32.mrb[2].mxu1 }
 0x122   :  { %v176_v18 = vadd.f32 %v175_v16, %v516_v7  ;;  %v224_v19 = vadd.f32 %v223_v17, %v516_v7  ;;  %v177_v20 = vpop.f32.mrb[3].mxu0  ;;  %v225_v21 = vpop.f32.mrb[3].mxu1 }
 0x123   :  { %v178_v22 = vadd.f32 %v177_v20, %v518_v8  ;;  %v226_v23 = vadd.f32 %v225_v21, %v518_v8 }
 0x124   :  { %266 = vst [vmem:[#allocation7 + $0x10] sm:$0xff] %v176_v18  ;;  %282 = vst [vmem:[#allocation7 + $0x90] sm:$0xff] %v224_v19 }
 0x125   :  { %267 = vst [vmem:[#allocation7 + $0x18] sm:$0xff] %v178_v22  ;;  %283 = vst [vmem:[#allocation7 + $0x98] sm:$0xff] %v226_v23  ;;  %v181_v24 = vpop.f32.mrb[4].mxu0  ;;  %v229_v25 = vpop.f32.mrb[4].mxu1 }
 0x126   :  { %v182_v26 = vadd.f32 %v181_v24, %v516_v7  ;;  %v230_v27 = vadd.f32 %v229_v25, %v516_v7  ;;  %v183_v28 = vpop.f32.mrb[5].mxu0  ;;  %v231_v29 = vpop.f32.mrb[5].mxu1 }
 0x127   :  { %v184_v30 = vadd.f32 %v183_v28, %v518_v8  ;;  %v232_v31 = vadd.f32 %v231_v29, %v518_v8 }
 0x128   :  { %268 = vst [vmem:[#allocation7 + $0x20] sm:$0xff] %v182_v26  ;;  %284 = vst [vmem:[#allocation7 + $0xa0] sm:$0xff] %v230_v27 }
 0x129   :  { %269 = vst [vmem:[#allocation7 + $0x28] sm:$0xff] %v184_v30  ;;  %285 = vst [vmem:[#allocation7 + $0xa8] sm:$0xff] %v232_v31  ;;  %v187_v32 = vpop.f32.mrb[6].mxu0  ;;  %v235_v33 = vpop.f32.mrb[6].mxu1 }
 0x12a   :  { %v188_v34 = vadd.f32 %v187_v32, %v516_v7  ;;  %v236_v35 = vadd.f32 %v235_v33, %v516_v7  ;;  %v189_v36 = vpop.f32.mrb[7].mxu0  ;;  %v237_v37 = vpop.f32.mrb[7].mxu1 }
 0x12b   :  { %v190_v38 = vadd.f32 %v189_v36, %v518_v8  ;;  %v238_v39 = vadd.f32 %v237_v37, %v518_v8 }
 0x12c   :  { %270 = vst [vmem:[#allocation7 + $0x30] sm:$0xff] %v188_v34  ;;  %286 = vst [vmem:[#allocation7 + $0xb0] sm:$0xff] %v236_v35 }
 0x12d   :  { %271 = vst [vmem:[#allocation7 + $0x38] sm:$0xff] %v190_v38  ;;  %287 = vst [vmem:[#allocation7 + $0xb8] sm:$0xff] %v238_v39  ;;  %v193_v40 = vpop.f32.mrb[8].mxu0  ;;  %v241_v41 = vpop.f32.mrb[8].mxu1 }
 0x12e   :  { %v194_v42 = vadd.f32 %v193_v40, %v516_v7  ;;  %v242_v43 = vadd.f32 %v241_v41, %v516_v7  ;;  %v195_v44 = vpop.f32.mrb[9].mxu0  ;;  %v243_v45 = vpop.f32.mrb[9].mxu1 }
 0x12f   :  { %v196_v46 = vadd.f32 %v195_v44, %v518_v8  ;;  %v244_v47 = vadd.f32 %v243_v45, %v518_v8 }
 0x130   :  { %272 = vst [vmem:[#allocation7 + $0x40] sm:$0xff] %v194_v42  ;;  %288 = vst [vmem:[#allocation7 + $0xc0] sm:$0xff] %v242_v43 }
 0x131   :  { %273 = vst [vmem:[#allocation7 + $0x48] sm:$0xff] %v196_v46  ;;  %289 = vst [vmem:[#allocation7 + $0xc8] sm:$0xff] %v244_v47  ;;  %v199_v48 = vpop.f32.mrb[10].mxu0  ;;  %v247_v49 = vpop.f32.mrb[10].mxu1 }
 0x132   :  { %v200_v50 = vadd.f32 %v199_v48, %v516_v7  ;;  %v248_v51 = vadd.f32 %v247_v49, %v516_v7  ;;  %v201_v52 = vpop.f32.mrb[11].mxu0  ;;  %v249_v53 = vpop.f32.mrb[11].mxu1 }
 0x133   :  { %v202_v54 = vadd.f32 %v201_v52, %v518_v8  ;;  %v250_v55 = vadd.f32 %v249_v53, %v518_v8 }
 0x134   :  { %274 = vst [vmem:[#allocation7 + $0x50] sm:$0xff] %v200_v50  ;;  %290 = vst [vmem:[#allocation7 + $0xd0] sm:$0xff] %v248_v51 }
 0x135   :  { %275 = vst [vmem:[#allocation7 + $0x58] sm:$0xff] %v202_v54  ;;  %291 = vst [vmem:[#allocation7 + $0xd8] sm:$0xff] %v250_v55  ;;  %v205_v56 = vpop.f32.mrb[12].mxu0  ;;  %v253_v57 = vpop.f32.mrb[12].mxu1 }
 0x136   :  { %v206_v58 = vadd.f32 %v205_v56, %v516_v7  ;;  %v254_v59 = vadd.f32 %v253_v57, %v516_v7  ;;  %v207_v60 = vpop.f32.mrb[13].mxu0  ;;  %v255_v61 = vpop.f32.mrb[13].mxu1 }
 0x137   :  { %v208_v62 = vadd.f32 %v207_v60, %v518_v8  ;;  %v256_v63 = vadd.f32 %v255_v61, %v518_v8 }
 0x138   :  { %276 = vst [vmem:[#allocation7 + $0x60] sm:$0xff] %v206_v58  ;;  %292 = vst [vmem:[#allocation7 + $0xe0] sm:$0xff] %v254_v59 }
 0x139   :  { %277 = vst [vmem:[#allocation7 + $0x68] sm:$0xff] %v208_v62  ;;  %293 = vst [vmem:[#allocation7 + $0xe8] sm:$0xff] %v256_v63  ;;  %v211_v1 = vpop.f32.mrb[14].mxu0  ;;  %v259_v2 = vpop.f32.mrb[14].mxu1 }
 0x13a   :  { %v212_v3 = vadd.f32 %v211_v1, %v516_v7  ;;  %v260_v4 = vadd.f32 %v259_v2, %v516_v7  ;;  %v213_v5 = vpop.f32.mrb[15].mxu0  ;;  %v261_v6 = vpop.f32.mrb[15].mxu1 }
 0x13b   :  { %v214_v9 = vadd.f32 %v213_v5, %v518_v8  ;;  %v262_v10 = vadd.f32 %v261_v6, %v518_v8 }
 0x13c   :  { %278 = vst [vmem:[#allocation7 + $0x70] sm:$0xff] %v212_v3  ;;  %294 = vst [vmem:[#allocation7 + $0xf0] sm:$0xff] %v260_v4 }
 0x13d   :  { %279 = vst [vmem:[#allocation7 + $0x78] sm:$0xff] %v214_v9  ;;  %295 = vst [vmem:[#allocation7 + $0xf8] sm:$0xff] %v262_v10 }
 0x13e   :  { %425 = shalt.err (!%p422_p6)
}
 0x13f   :  { %s426_s17 = scalar_lea.hbm %s570_s3, 4096 }
 0x140   :  { %p427_p7 = scmp.ne.s32.totalorder %s570_s3, %s426_s17  ;;  %p430_p8 = scmp.lt.u32.totalorder %s426_s17, %s570_s3 }
 0x142   :  { %p432_p9 = pnand %p430_p8, %p427_p7 }
 0x144   :  { %435 = shalt.err (!%p432_p9)
}
 0x145   :  { %307 = dma.vmem_to_hbm [thread:$0]  %s302_s13, 4096, %s570_s3, [#allocation4], %s446_s0, %s446_s0, %s447_s9  }
 0x146   :  { %440 = dma.done.wait [#allocation4], 4096  }
 0x147   :  { %441 = vsyncadd [#allocation4], 4294963200 }
 0x148   :  { %311 = vsyncpa [#allocation3], 1 }
 0x149   :  { %312 = vsyncpa [#allocation6], 1 }
 0x14a   :  { %313 = vsyncpa [#allocation4], 1 }

</bundles_post_ra>
